<compile_context>
chip_gen: v7x
topology: tpu7x:2x2x1
jax: 0.10.0
libtpu: 0.0.40
codegen_flags: <defaults>
</compile_context>

<pallas_src>
import jax
import jax.numpy as jnp
from jax.experimental import pallas as pl
from jax.experimental.pallas import tpu as pltpu


def _round_up(x, m):
    return ((x + m - 1) // m) * m


def _embed_onehot_kernel(ids_ref, table_ref, out_ref, acc_ref):
    # ids_ref:   (chunk, 1) int32 token ids for this chunk (VMEM).
    # table_ref: (v_block, D) embedding-table tile for this vocab block (VMEM).
    # out_ref:   (chunk, D) output tile (resident across the vocab axis).
    # acc_ref:   (chunk, D) f32 accumulator scratch.
    j = pl.program_id(1)

    @pl.when(j == 0)
    def _():
        acc_ref[...] = jnp.zeros_like(acc_ref)

    chunk = ids_ref.shape[0]
    v_block = table_ref.shape[0]

    ids = ids_ref[...]                                        # (chunk, 1) i32
    vocab_ids = j * v_block + jax.lax.broadcasted_iota(
        jnp.int32, (chunk, v_block), 1)                       # (chunk, v_block)
    one_hot = (vocab_ids == ids).astype(table_ref.dtype)      # exact 0/1
    acc_ref[...] += jnp.dot(
        one_hot, table_ref[...],
        precision=jax.lax.Precision.HIGHEST,
        preferred_element_type=jnp.float32)

    @pl.when(j == pl.num_programs(1) - 1)
    def _():
        out_ref[...] = acc_ref[...].astype(out_ref.dtype)


def embedding_lookup(ids_flat, table, *, max_chunk=512, max_vocab_block=1024):
    """Gather rows of `table` ([V, D]) at `ids_flat` ([N]) -> [N, D]."""
    n = int(ids_flat.shape[0])
    v, d = (int(s) for s in table.shape)
    out_dtype = table.dtype

    ids = ids_flat.astype(jnp.int32)

    # Token-chunk size: large enough to amortize per-grid-step overhead and
    # give dense (chunk, D) writeback DMAs; shrunk (8-rounded) for tiny inputs
    # so no padding / trailing slice-copy is needed.
    n8 = _round_up(max(n, 1), 8)
    chunk = n8 if n8 <= max_chunk else max_chunk
    n_pad = _round_up(n, chunk)
    if n_pad != n:
        ids = jnp.pad(ids, (0, n_pad - n))   # pad id 0 -> padding row, sliced off
    ids = ids.reshape(n_pad, 1)

    # Vocab blocking: whole table for small vocabs, 1024-row tiles otherwise.
    if v <= max_vocab_block:
        v_block, v_pad = v, v
    else:
        v_block = max_vocab_block
        v_pad = _round_up(v, v_block)
    if v_pad != v:
        # Zero rows: never matched by an in-range id, contribute nothing.
        table = jnp.pad(table, ((0, v_pad - v), (0, 0)))

    num_chunks = n_pad // chunk
    num_vblocks = v_pad // v_block

    # Explicit VMEM budget (double-buffered pipeline tiles + accumulator).
    itemsize = jnp.dtype(table.dtype).itemsize
    vmem_needed = (
        2 * v_block * d * itemsize      # table tiles
        + 2 * chunk * 128 * 4           # ids tiles (lane-padded int32)
        + 2 * chunk * d * itemsize      # output tiles
        + chunk * d * 4                 # f32 accumulator scratch
    )
    # TODO(synk): if a configuration ever exceeds this budget, switch to an
    # HBM-resident table (memory_space=pl.ANY) with manual row DMAs.
    assert vmem_needed <= (40 << 20), (
        f"embedding_lookup VMEM footprint {vmem_needed} B exceeds the 40 MiB "
        f"budget (v_block={v_block}, d={d}, chunk={chunk})")
    vmem_limit = int(min(max(vmem_needed + (4 << 20), 16 << 20), 48 << 20))

    grid_spec = pltpu.PrefetchScalarGridSpec(
        num_scalar_prefetch=0,
        grid=(num_chunks, num_vblocks),
        in_specs=[
            pl.BlockSpec((chunk, 1), lambda i, j: (i, 0)),      # ids
            pl.BlockSpec((v_block, d), lambda i, j: (j, 0)),    # table tile
        ],
        out_specs=pl.BlockSpec((chunk, d), lambda i, j: (i, 0)),
        scratch_shapes=[pltpu.VMEM((chunk, d), jnp.float32)],
    )
    out = pl.pallas_call(
        _embed_onehot_kernel,
        grid_spec=grid_spec,
        out_shape=jax.ShapeDtypeStruct((n_pad, d), out_dtype),
        compiler_params=pltpu.CompilerParams(
            dimension_semantics=("parallel", "arbitrary"),
            vmem_limit_bytes=vmem_limit,
        ),
    )(ids, table)
    # Skip the slice (an extra HBM copy) whenever no padding was added.
    return out if n_pad == n else out[:n]


class ClassifierPallas:
    """JAX/Pallas analogue of the PyTorch Classifier base class."""

    def __init__(self, token_vocab_size, char_vocab_size, dim,
                 padding_idx=0, uniform_bound=0.1, seed=0):
        k_tok, k_chr = jax.random.split(jax.random.PRNGKey(seed))
        # EmbeddingType.EMBEDDING, uniform init in [-bound, bound],
        # padding row zeroed (VOCAB_PADDING).
        tok = jax.random.uniform(k_tok, (token_vocab_size, dim),
                                 jnp.float32, -uniform_bound, uniform_bound)
        chr_ = jax.random.uniform(k_chr, (char_vocab_size, dim),
                                  jnp.float32, -uniform_bound, uniform_bound)
        self.token_embedding = tok.at[padding_idx].set(0.0)
        self.char_embedding = chr_.at[padding_idx].set(0.0)
        self.padding_idx = padding_idx

    def get_embedding(self, batch, pad_shape=None, pad_value=0):
        # feature_names[0] == 'token' branch of the PyTorch module.
        token_id = batch["doc_token"]                     # [B, S] int32
        if pad_shape is not None:
            token_id = jnp.pad(token_id, pad_shape,
                               mode="constant", constant_values=pad_value)
        b, s = token_id.shape
        emb = embedding_lookup(token_id.reshape(-1), self.token_embedding)
        emb = emb.reshape(b, s, -1)
        # embedding dropout / hidden_layer_dropout: identity at inference.
        length = batch["doc_token_len"]
        mask = batch["doc_token_mask"]
        return emb, length, mask

    def forward(self, batch):
        # TODO(synk): base Classifier.forward raises NotImplementedError in
        # PyTorch; only get_embedding has concrete compute to translate.
        raise NotImplementedError


if __name__ == "__main__":
    # --- main demo: Classifier.get_embedding at small module-consistent shapes
    B, S = 2, 8            # batch, sequence length
    V_TOK, V_CHR = 64, 64  # vocab sizes
    D = 128                # config.embedding.dimension
    PAD = 0                # dataset.VOCAB_PADDING

    key = jax.random.PRNGKey(0)
    k_ids, k_big_ids, k_big_tab = jax.random.split(key, 3)
    token_id = jax.random.randint(k_ids, (B, S), 0, V_TOK, dtype=jnp.int32)
    mask = (token_id != PAD).astype(jnp.float32)          # DOC_TOKEN_MASK
    length = mask.sum(axis=-1).astype(jnp.int32)          # DOC_TOKEN_LEN
    batch = {"doc_token": token_id,
             "doc_token_len": length,
             "doc_token_mask": mask}

    clf = ClassifierPallas(V_TOK, V_CHR, D, padding_idx=PAD, seed=0)
    emb, out_len, out_mask = clf.get_embedding(batch)
    emb = jax.block_until_ready(emb)

    # Reference check against a plain-JAX gather (bit-exact with the HIGHEST-
    # precision one-hot matmul; tiny tolerance only as a safety margin).
    ref = jnp.take(clf.token_embedding, token_id.reshape(-1), axis=0)
    ref = ref.reshape(B, S, D)
    assert emb.shape == (B, S, D)
    assert jnp.allclose(emb, ref, atol=5e-4, rtol=0.0)
    assert jnp.array_equal(out_len, length)
    assert jnp.array_equal(out_mask, mask)

    # --- secondary check: multi-chunk / multi-vocab-block path
    N2, V2 = 1200, 1536    # -> 3 chunks of 512 (padded), 2 vocab blocks of 1024
    big_table = jax.random.uniform(k_big_tab, (V2, D), jnp.float32, -0.1, 0.1)
    big_ids = jax.random.randint(k_big_ids, (N2,), 0, V2, dtype=jnp.int32)
    big_out = jax.block_until_ready(embedding_lookup(big_ids, big_table))
    big_ref = jnp.take(big_table, big_ids, axis=0)
    assert big_out.shape == (N2, D)
    assert jnp.allclose(big_out, big_ref, atol=5e-4, rtol=0.0)

    print("KERNEL_OK")
</pallas_src>

<mosaic_0001>
module attributes {stable_mosaic.version = 11 : i64} {
  func.func @_embed_onehot_kernel(%arg0: i32, %arg1: i32, %arg2: memref<16x1xi32, #tpu.memory_space<vmem>>, %arg3: memref<64x128xf32, #tpu.memory_space<vmem>>, %arg4: memref<16x128xf32, #tpu.memory_space<vmem>>, %arg5: memref<16x128xf32, #tpu.memory_space<vmem>>) attributes {dimension_semantics = [#tpu.dimension_semantics<parallel>, #tpu.dimension_semantics<arbitrary>], iteration_bounds = array<i64: 1, 1>, scalar_prefetch = 0 : i64, scratch_operands = 1 : i64, tpu.core_type = #tpu.core_type<tc>, window_params = [{transform_indices = @transform_0, window_bounds = array<i64: 16, 1>}, {transform_indices = @transform_1, window_bounds = array<i64: 64, 128>}, {transform_indices = @transform_2, window_bounds = array<i64: 16, 128>}]} {
    %c0_i32 = arith.constant 0 : i32
    %0 = arith.cmpi eq, %arg1, %c0_i32 : i32
    %1 = arith.extui %0 : i1 to i32
    %c0_i32_0 = arith.constant 0 : i32
    %2 = arith.cmpi ne, %1, %c0_i32_0 : i32
    scf.if %2 {
      %cst_10 = arith.constant 0.000000e+00 : f32
      %20 = vector.broadcast %cst_10 : f32 to vector<16x128xf32>
      %c0_11 = arith.constant 0 : index
      %c0_12 = arith.constant 0 : index
      %21 = vector.load %arg5[%c0_11, %c0_12] : memref<16x128xf32, #tpu.memory_space<vmem>>, vector<16x128xf32>
      tpu.vector_store %arg5[%c0_11, %c0_12], %20 {strides = array<i32>} : memref<16x128xf32, #tpu.memory_space<vmem>>, vector<16x128xf32>,
    } else {
    }
    %c0 = arith.constant 0 : index
    %c0_1 = arith.constant 0 : index
    %3 = vector.load %arg2[%c0, %c0_1] : memref<16x1xi32, #tpu.memory_space<vmem>>, vector<16x1xi32>
    %c64_i32 = arith.constant 64 : i32
    %4 = arith.muli %arg1, %c64_i32 : i32
    %5 = tpu.iota {dimensions = array<i32: 1>} : vector<16x64xi32>
    %6 = vector.broadcast %4 : i32 to vector<16x64xi32>
    %7 = arith.addi %6, %5 : vector<16x64xi32>
    %8 = vector.broadcast %3 : vector<16x1xi32> to vector<16x64xi32>
    %9 = arith.cmpi eq, %7, %8 : vector<16x64xi32>
    %10 = arith.extui %9 : vector<16x64xi1> to vector<16x64xi32>
    %11 = arith.sitofp %10 : vector<16x64xi32> to vector<16x64xf32>
    %c0_2 = arith.constant 0 : index
    %c0_3 = arith.constant 0 : index
    %12 = vector.load %arg5[%c0_2, %c0_3] : memref<16x128xf32, #tpu.memory_space<vmem>>, vector<16x128xf32>
    %c0_4 = arith.constant 0 : index
    %c0_5 = arith.constant 0 : index
    %13 = vector.load %arg3[%c0_4, %c0_5] : memref<64x128xf32, #tpu.memory_space<vmem>>, vector<64x128xf32>
    %cst = arith.constant dense<0.000000e+00> : vector<16x128xf32>
    %14 = tpu.matmul %11, %13, %cst {dimension_numbers = #tpu.dot_dimension_numbers<[1], [0], [0], [1], [0, 0, 1, 1], [], []>, precision = #tpu.contract_precision<fp32>} : vector<16x64xf32>, vector<64x128xf32>, vector<16x128xf32> -> vector<16x128xf32>
    %15 = arith.addf %12, %14 : vector<16x128xf32>
    %c0_6 = arith.constant 0 : index
    %c0_7 = arith.constant 0 : index
    %16 = vector.load %arg5[%c0_6, %c0_7] : memref<16x128xf32, #tpu.memory_space<vmem>>, vector<16x128xf32>
    tpu.vector_store %arg5[%c0_6, %c0_7], %15 {strides = array<i32>} : memref<16x128xf32, #tpu.memory_space<vmem>>, vector<16x128xf32>,
    %c0_i32_8 = arith.constant 0 : i32
    %17 = arith.cmpi eq, %arg1, %c0_i32_8 : i32
    %18 = arith.extui %17 : i1 to i32
    %c0_i32_9 = arith.constant 0 : i32
    %19 = arith.cmpi ne, %18, %c0_i32_9 : i32
    scf.if %19 {
      %c0_10 = arith.constant 0 : index
      %c0_11 = arith.constant 0 : index
      %20 = vector.load %arg5[%c0_10, %c0_11] : memref<16x128xf32, #tpu.memory_space<vmem>>, vector<16x128xf32>
      %c0_12 = arith.constant 0 : index
      %c0_13 = arith.constant 0 : index
      %21 = vector.load %arg4[%c0_12, %c0_13] : memref<16x128xf32, #tpu.memory_space<vmem>>, vector<16x128xf32>
      tpu.vector_store %arg4[%c0_12, %c0_13], %20 {strides = array<i32>} : memref<16x128xf32, #tpu.memory_space<vmem>>, vector<16x128xf32>,
    } else {
    }
    return
  }
  func.func @transform_0(%arg0: i32, %arg1: i32) -> (i32, i32) {
    %c0_i32 = arith.constant 0 : i32
    %c0_i32_0 = arith.constant 0 : i32
    return %arg0, %c0_i32 : i32, i32
  }
  func.func @transform_1(%arg0: i32, %arg1: i32) -> (i32, i32) {
    %c0_i32 = arith.constant 0 : i32
    %c0_i32_0 = arith.constant 0 : i32
    return %arg1, %c0_i32 : i32, i32
  }
  func.func @transform_2(%arg0: i32, %arg1: i32) -> (i32, i32) {
    %c0_i32 = arith.constant 0 : i32
    %c0_i32_0 = arith.constant 0 : i32
    return %arg0, %c0_i32 : i32, i32
  }
}

</mosaic_0001>

<bundles_post_ra>
// kernel: tpu_custom_call.1
= control target key start
LH: loop header
LB: loop body
LE: loop exit
PB: predicated region body
PF: predicated region fallthrough
CT: control target
= control target key end

     0   :  { %7 = vsyncpa [#allocation4], 0  ;;  %s1120_s0 = inlined_call_operand.vmem [shape: s32[16,1], index: 0, kind: input, shape index: {}]   ;;  %s1121_s1 = inlined_call_operand.hbm [shape: f32[64,128], index: 1, kind: input, shape index: {}]   ;;  %s1122_s2 = inlined_call_operand.hbm [shape: f32[16,128], index: 2, kind: output, shape index: {}]  }
   0x1   :  { %8 = vsyncpa [#allocation5], 0  ;;  %s1019_s9 = smov [#allocation3]   ;;  %s971_s13 = scalar_lea.hbm %s1121_s1, 1024 }
   0x2   :  { %s16_s10 = sshll.u32 %s1019_s9, 4  ;;  %p972_p0 = scmp.ne.s32.totalorder %s1121_s1, %s971_s13  ;;  %s17_s10 = int_to_ptr.vmem [resolvable:$true] %s16_s10 }
   0x3   :  { %p975_p1 = scmp.lt.u32.totalorder %s971_s13, %s1121_s1 }
   0x5   :  { %p977_p2 = pnand %p975_p1, %p972_p0 }
   0x7   :  { %980 = shalt.err (!%p977_p2)
}
   0x8   :  { %s981_s18 = scalar_lea.vmem %s17_s10, 1024  ;;  %p986_p4 = scmp.lt.s32.totalorder %s17_s10, %s17_s10 }
   0x9   :  { %p982_p3 = scmp.ne.s32.totalorder %s17_s10, %s981_s18  ;;  %p987_p5 = scmp.lt.s32.totalorder %s981_s18, %s981_s18 }
   0xb   :  { %p988_p6 = por %p987_p5, %p986_p4 }
   0xd   :  { %p989_p7 = pnand %p988_p6, %p982_p3 }
   0xf   :  { %992 = shalt.err (!%p989_p7)
}
  0x10   :  { %s1020_s19 = smov 128   ;;  %s1021_s20 = smov 8  }
  0x11   :  { %22 = dma.hbm_to_vmem [thread:$0]  %s1121_s1, 1024, %s17_s10, [#allocation4], %s1020_s19, %s1020_s19, %s1021_s20  }
  0x12   :  { %1015 = dma.done.wait [#allocation4], 1024  }
  0x13   :  { %1016 = vsyncadd [#allocation4], 4294966272  ;;  %v1022_v0 = vmov 0   ;;  %v32_v1 = vld [vmem:[%s1120_s0] sm:$0xff]  ;;  %v54_v3 = vld [vmem:[#allocation3 + $0x8] sm:$0xff]  ;;  %vm61_vm0 = vcmask 523264  }
  0x14   :  { %970 = vset.pattern.permute.xlu0 %v1022_v0  ;;  %v53_v2 = vld [vmem:[#allocation3] sm:$0xff]  ;;  %v55_v5 = vld [vmem:[#allocation3 + $0x10] sm:$0xff]  ;;  %v56_v6 = vld [vmem:[#allocation3 + $0x18] sm:$0xff]  ;;  %v72_v8 = vand.u32 4294901760, %v54_v3 }
  0x15   :  { %40 = vperm.xlu0 %970, %v32_v1   ;;  %v69_v4 = vand.u32 4294901760, %v53_v2  ;;  %v33_v7 = vld [vmem:[%s1120_s0 + $0x8] sm:$0xff]  ;;  %v75_v9 = vand.u32 4294901760, %v55_v5  ;;  %v78_v10 = vand.u32 4294901760, %v56_v6  ;;  %v57_v11 = vld [vmem:[#allocation3 + $0x20] sm:$0xff]  ;;  %v59_v17 = vld [vmem:[#allocation3 + $0x30] sm:$0xff] }
  0x16   :  { %v58_v12 = vld [vmem:[#allocation3 + $0x28] sm:$0xff]  ;;  %v81_v15 = vand.u32 4294901760, %v57_v11  ;;  %v60_v18 = vld [vmem:[#allocation3 + $0x38] sm:$0xff]  ;;  %v170_v20 = vsub.f32 %v54_v3, %v72_v8  ;;  %v87_v21 = vand.u32 4294901760, %v59_v17  ;;  %v35_v3 = vlaneseq  ;;  %s1024_s0 = smov [#allocation6]  }
  0x17   :  { %v1061_v13 = vpack.c.bf16 %v72_v8, %v69_v4  ;;  %v1063_v14 = vpack.c.bf16 %v78_v10, %v75_v9  ;;  %v84_v16 = vand.u32 4294901760, %v58_v12  ;;  %v163_v19 = vsub.f32 %v53_v2, %v69_v4  ;;  %s664_s1 = sshll.u32 %s1024_s0, 4  ;;  %s665_s1 = int_to_ptr.vmem [resolvable:$true] %s664_s1 }
  0x18   :  { %v90_v22 = vand.u32 4294901760, %v60_v18  ;;  %v171_v24 = vand.u32 4294901760, %v170_v20  ;;  %v177_v28 = vsub.f32 %v55_v5, %v75_v9  ;;  %v184_v29 = vsub.f32 %v56_v6, %v78_v10  ;;  %s993_s27 = scalar_lea.vmem %s665_s1, 256  ;;  %p998_p9 = scmp.lt.s32.totalorder %s665_s1, %s665_s1 }
  0x19   :  { %43 = vperm.xlu0 %970, %v33_v7   ;;  %907 = vmatprep.subr.bf16.mxu0 %v1061_v13  ;;  %v164_v23 = vand.u32 4294901760, %v163_v19  ;;  %v1071_v25 = vpack.c.bf16 %v84_v16, %v81_v15  ;;  %v191_v38 = vsub.f32 %v57_v11, %v81_v15  ;;  %v198_v39 = vsub.f32 %v58_v12, %v84_v16  ;;  %p994_p8 = scmp.ne.s32.totalorder %s665_s1, %s993_s27  ;;  %p999_p10 = scmp.lt.s32.totalorder %s993_s27, %s993_s27 }
  0x1a   :  { %859 = vmatprep.subr.bf16.mxu1 %v1061_v13  ;;  %909 = vmatpush3.bf16.msra.mxu0 %v1061_v13  ;;  %v172_v27 = vsub.f32 %v170_v20, %v171_v24  ;;  %v1075_v30 = vpack.c.bf16 %v90_v22, %v87_v21  ;;  %v178_v33 = vand.u32 4294901760, %v177_v28  ;;  %v185_v34 = vand.u32 4294901760, %v184_v29 }
  0x1b   :  { %861 = vmatpush3.bf16.msra.mxu1 %v1061_v13  ;;  %911 = vmatprep.subr.bf16.mxu0 %v1063_v14  ;;  %v165_v26 = vsub.f32 %v163_v19, %v164_v23  ;;  %v922_v40 = vpack.c.bf16 %v171_v24, %v164_v23  ;;  %v192_v44 = vand.u32 4294901760, %v191_v38  ;;  %v199_v45 = vand.u32 4294901760, %v198_v39  ;;  %p1000_p11 = por %p999_p10, %p998_p9 }
  0x1c   :  { %863 = vmatprep.subr.bf16.mxu1 %v1063_v14  ;;  %v173_v32 = vand.u32 4294901760, %v172_v27  ;;  %v1079_v35 = vpack.c.bf16 %v185_v34, %v178_v33  ;;  %v179_v36 = vsub.f32 %v177_v28, %v178_v33  ;;  %v186_v37 = vsub.f32 %v184_v29, %v185_v34 }
  0x1d   :  { %v166_v31 = vand.u32 4294901760, %v165_v26  ;;  %v205_v47 = vsub.f32 %v59_v17, %v87_v21  ;;  %v212_v48 = vsub.f32 %v60_v18, %v90_v22  ;;  %v930_v49 = vpack.c.bf16 %v199_v45, %v192_v44  ;;  %p1001_p12 = pnand %p1000_p11, %p994_p8 }
  0x1e   :  { %913 = vmatpush3.bf16.msra.mxu0 %v1063_v14  ;;  %v180_v42 = vand.u32 4294901760, %v179_v36  ;;  %v187_v43 = vand.u32 4294901760, %v186_v37  ;;  %v193_v50 = vsub.f32 %v191_v38, %v192_v44  ;;  %v200_v51 = vsub.f32 %v198_v39, %v199_v45 }
  0x1f   :  { %865 = vmatpush3.bf16.msra.mxu1 %v1063_v14  ;;  %915 = vmatprep.subr.bf16.mxu0 %v1071_v25  ;;  %v874_v41 = vpack.c.bf16 %v173_v32, %v166_v31  ;;  %v206_v52 = vand.u32 4294901760, %v205_v47  ;;  %v213_v53 = vand.u32 4294901760, %v212_v48  ;;  %v890_v63 = vpack.c.bf16 %v170_v20, %v163_v19 }
  0x20   :  { %867 = vmatprep.subr.bf16.mxu1 %v1071_v25  ;;  %v878_v46 = vpack.c.bf16 %v187_v43, %v180_v42  ;;  %v194_v54 = vand.u32 4294901760, %v193_v50  ;;  %v201_v55 = vand.u32 4294901760, %v200_v51  ;;  %v894_v0 = vpack.c.bf16 %v184_v29, %v177_v28 }
  0x21   :  { %v934_v56 = vpack.c.bf16 %v213_v53, %v206_v52  ;;  %v207_v57 = vsub.f32 %v205_v47, %v206_v52  ;;  %v214_v58 = vsub.f32 %v212_v48, %v213_v53  ;;  %v898_v1 = vpack.c.bf16 %v198_v39, %v191_v38 }
  0x22   :  { %917 = vmatpush3.bf16.msra.mxu0 %v1071_v25  ;;  %v882_v59 = vpack.c.bf16 %v201_v55, %v194_v54  ;;  %v902_v2 = vpack.c.bf16 %v212_v48, %v205_v47  ;;  %v36_v4 = vand.u32 127, %v35_v3  ;;  %v1023_v6 = vmov 0.0  }
  0x23   :  { %869 = vmatpush3.bf16.msra.mxu1 %v1071_v25  ;;  %919 = vmatprep.subr.bf16.mxu0 %v1075_v30  ;;  %v208_v60 = vand.u32 4294901760, %v207_v57  ;;  %v215_v61 = vand.u32 4294901760, %v214_v58 }
  0x24   :  { %871 = vmatprep.subr.bf16.mxu1 %v1075_v30 }
  0x25   :  { %v886_v62 = vpack.c.bf16 %v215_v61, %v208_v60 }
  0x26   :  { %921 = vmatpush3.bf16.msra.mxu0 %v1075_v30 }
  0x27   :  { %873 = vmatpush3.bf16.msra.mxu1 %v1075_v30  ;;  %923 = vmatprep.subr.bf16.mxu0 %v922_v40 }
  0x28   :  { %875 = vmatprep.subr.bf16.mxu1 %v874_v41 }
  0x94   :  { %v41_v5 = vpop.permute.xlu0 %40 }
  0x95   :  { %vm45_vm1 = vcmp.eq.s32.totalorder %v36_v4, %v41_v5 }
  0x96   :  { %v676_v7 = vsel %vm45_vm1, 1.0, %v1023_v6 }
  0x97   :  { %v63_v8 = vsel %vm61_vm0, %v676_v7, 0 }
  0x98   :  { %v142_v9 = vsub.f32 %v63_v8, %v63_v8  ;;  %v44_v10 = vpop.permute.xlu0 %43 }
  0x99   :  { %vm46_vm2 = vcmp.eq.s32.totalorder %v36_v4, %v44_v10 }
  0x9a   :  { %v677_v11 = vsel %vm46_vm2, 1.0, %v1023_v6  ;;  %v143_v12 = vand.u32 4294901760, %v142_v9 }
  0x9b   :  { %v66_v15 = vsel %vm61_vm0, %v677_v11, 0 }
  0x9c   :  { %v152_v16 = vsub.f32 %v66_v15, %v66_v15  ;;  %817 = vmatprep.mubr.f32.mxu0 %v143_v12  ;;  %v144_v17 = vsub.f32 %v142_v9, %v143_v12 }
  0x9e   :  { %v145_v18 = vand.u32 4294901760, %v144_v17  ;;  %v153_v19 = vand.u32 4294901760, %v152_v16 }
  0xa0   :  { %760 = vmatprep.mubr.f32.mxu1 %v145_v18  ;;  %818 = vmatmul.mubr.f32.vlgmr.msra.gmra.mrb[0].mxu0 %v153_v19  ;;  %v154_v20 = vsub.f32 %v152_v16, %v153_v19 }
  0xa1   :  { %925 = vmatpush3.bf16.msra.mxu0 %v922_v40  ;;  %836 = vmatprep.mubr.msk.f32.mxu0 %vm61_vm0, %v676_v7 }
  0xa2   :  { %927 = vmatprep.subr.bf16.mxu0 %v1079_v35  ;;  %v155_v21 = vand.u32 4294901760, %v154_v20 }
  0xa4   :  { %761 = vmatmul.mubr.f32.vlgmr.msra.gmra.mrb[0].mxu1 %v155_v21 }
  0xa5   :  { %877 = vmatpush3.bf16.msra.mxu1 %v874_v41  ;;  %929 = vmatpush3.bf16.msra.mxu0 %v1079_v35 }
  0xa6   :  { %779 = vmatprep.mubr.msk.f32.mxu1 %vm61_vm0, %v676_v7  ;;  %879 = vmatprep.subr.bf16.mxu1 %v878_v46 }
  0xa7   :  { %931 = vmatprep.subr.bf16.mxu0 %v930_v49 }
  0xa9   :  { %881 = vmatpush3.bf16.msra.mxu1 %v878_v46  ;;  %933 = vmatpush3.bf16.msra.mxu0 %v930_v49 }
  0xaa   :  { %883 = vmatprep.subr.bf16.mxu1 %v882_v59  ;;  %935 = vmatprep.subr.bf16.mxu0 %v934_v56 }
  0xad   :  { %885 = vmatpush3.bf16.msra.mxu1 %v882_v59  ;;  %937 = vmatpush3.bf16.msra.mxu0 %v934_v56 }
  0xae   :  { %887 = vmatprep.subr.bf16.mxu1 %v886_v62  ;;  %939 = vmatprep.subr.bf16.mxu0 %v1061_v13 }
  0xb0   :  { %837 = vmatmul.mubr.msk.f32.vlgmr.msra.gmra.mrb[0].mxu0 %vm61_vm0, %v677_v11 }
  0xb1   :  { %889 = vmatpush3.bf16.msra.mxu1 %v886_v62  ;;  %941 = vmatpush3.bf16.msra.mxu0 %v1061_v13 }
  0xb2   :  { %855 = vmatprep.mubr.msk.f32.mxu0 %vm61_vm0, %v676_v7  ;;  %891 = vmatprep.subr.bf16.mxu1 %v890_v63 }
  0xb3   :  { %943 = vmatprep.subr.bf16.mxu0 %v1063_v14 }
  0xb4   :  { %780 = vmatmul.mubr.msk.f32.vlgmr.msra.gmra.mrb[0].mxu1 %vm61_vm0, %v677_v11 }
  0xb5   :  { %893 = vmatpush3.bf16.msra.mxu1 %v890_v63  ;;  %798 = vmatprep.mubr.f32.mxu1 %v142_v9 }
  0xb6   :  { %945 = vmatpush3.bf16.msra.mxu0 %v1063_v14  ;;  %895 = vmatprep.subr.bf16.mxu1 %v894_v0 }
  0xb7   :  { %947 = vmatprep.subr.bf16.mxu0 %v1071_v25 }
  0xb9   :  { %897 = vmatpush3.bf16.msra.mxu1 %v894_v0 }
  0xba   :  { %949 = vmatpush3.bf16.msra.mxu0 %v1071_v25  ;;  %899 = vmatprep.subr.bf16.mxu1 %v898_v1 }
  0xbb   :  { %951 = vmatprep.subr.bf16.mxu0 %v1075_v30 }
  0xbd   :  { %901 = vmatpush3.bf16.msra.mxu1 %v898_v1 }
  0xbe   :  { %953 = vmatpush3.bf16.msra.mxu0 %v1075_v30  ;;  %903 = vmatprep.subr.bf16.mxu1 %v902_v2 }
  0xc1   :  { %856 = vmatmul.mubr.msk.f32.vlgmr.msra.gmra.mrb[0].mxu0 %vm61_vm0, %v677_v11  ;;  %905 = vmatpush3.bf16.msra.mxu1 %v902_v2 }
  0xc4   :  { %799 = vmatmul.mubr.f32.vlgmr.msra.gmra.mrb[0].mxu1 %v152_v16 }
 0x194   :  { %v857_v13 = vpop.f32.mrb[0].mxu0 }
 0x195   :  { %v638_v22 = vpop.f32.mrb[1].mxu0 }
 0x197   :  { %v800_v14 = vpop.f32.mrb[0].mxu1 }
 0x198   :  { %v954_v23 = vadd.f32 %v857_v13, %v800_v14  ;;  %v362_v24 = vpop.f32.mrb[1].mxu1 }
 0x199   :  { %v955_v26 = vadd.f32 %v638_v22, %v362_v24 }
 0x19a   :  { %658 = vst [vmem:[#allocation6 + $0x8] sm:$0xff] %v954_v23 }
 0x19b   :  { %657 = vst [vmem:[#allocation6] sm:$0xff] %v955_v26 }
 0x19c   :  { %1004 = shalt.err (!%p1001_p12)
}
 0x19d   :  { %s1005_s30 = scalar_lea.hbm %s1122_s2, 256 }
 0x19e   :  { %p1006_p13 = scmp.ne.s32.totalorder %s1122_s2, %s1005_s30  ;;  %p1009_p0 = scmp.lt.u32.totalorder %s1005_s30, %s1122_s2 }
 0x1a0   :  { %p1011_p1 = pnand %p1009_p0, %p1006_p13 }
 0x1a2   :  { %1014 = shalt.err (!%p1011_p1)
}
 0x1a3   :  { %670 = dma.vmem_to_hbm [thread:$0]  %s665_s1, 256, %s1122_s2, [#allocation5], %s1020_s19, %s1020_s19, %s1021_s20  }
 0x1a4   :  { %1017 = dma.done.wait [#allocation5], 256  }
 0x1a5   :  { %1018 = vsyncadd [#allocation5], 4294967040 }
 0x1a6   :  { %674 = vsyncpa [#allocation4], 1 }
 0x1a7   :  { %675 = vsyncpa [#allocation5], 1 }

</bundles_post_ra>
